<compile_context>
chip_gen: v6e
topology: v6e:2x2x1
jax: 0.10.0
libtpu: 0.0.40
codegen_flags: <defaults>
</compile_context>

<pallas_src>
import jax
import jax.numpy as jnp
from jax.experimental import pallas as pl
from jax.experimental.pallas import tpu as pltpu


def _add_pe_kernel(x_ref, pe_ref, o_ref):
    # x_ref : (TP, B, D) tile in VMEM
    # pe_ref: (TP, 1, D) tile in VMEM -> broadcasts over the batch (sublane) axis
    o_ref[...] = x_ref[...] + pe_ref[...]


def _pick_tile(patches: int, bytes_per_row: int, target_block_bytes: int) -> int:
    """Largest patches-tile whose x block is ~target_block_bytes, preferring a
    divisor of `patches` (avoids padded boundary blocks) when one is nearby."""
    tp = max(1, min(patches, target_block_bytes // max(1, bytes_per_row)))
    for cand in range(tp, max(tp // 2, 1) - 1, -1):
        if patches % cand == 0:
            return cand
    return tp  # fall back to pl.cdiv grid with a (masked) partial last block


def learned_positional_embeddings(
    x: jax.Array,
    positional_encodings: jax.Array,
    *,
    target_block_bytes: int = 2 * 1024 * 1024,
) -> jax.Array:
    """x: [patches, batch, d_model]; positional_encodings: [max_len, 1, d_model]."""
    patches, batch, d_model = x.shape
    max_len = positional_encodings.shape[0]
    assert positional_encodings.shape == (max_len, 1, d_model)
    assert patches <= max_len, "sequence longer than the learned PE table"

    bytes_per_row = batch * d_model * x.dtype.itemsize
    tp = _pick_tile(patches, bytes_per_row, target_block_bytes)
    grid = (pl.cdiv(patches, tp),)

    return pl.pallas_call(
        _add_pe_kernel,
        out_shape=jax.ShapeDtypeStruct((patches, batch, d_model), x.dtype),
        grid_spec=pl.GridSpec(
            grid=grid,
            in_specs=[
                # x: tile the patches axis, keep (batch, d_model) full.
                pl.BlockSpec((tp, batch, d_model), lambda i: (i, 0, 0)),
                # pe: window the *full* table; only rows [0, patches) are touched.
                pl.BlockSpec((tp, 1, d_model), lambda i: (i, 0, 0)),
            ],
            out_specs=pl.BlockSpec((tp, batch, d_model), lambda i: (i, 0, 0)),
        ),
        compiler_params=pltpu.CompilerParams(
            # Independent tiles -> shard across both TensorCores on v7x.
            dimension_semantics=("parallel",),
        ),
    )(x, positional_encodings)


if __name__ == "__main__":
    key = jax.random.PRNGKey(0)

    # --- small test at module-consistent shapes -------------------------------
    patches, batch, d_model = 8, 2, 32
    max_len = 64  # small stand-in for the module's max_len=5000
    kx, kp, kx2, kp2 = jax.random.split(key, 4)

    x = jax.random.normal(kx, (patches, batch, d_model), dtype=jnp.float32)
    # nn.Parameter(torch.zeros(max_len, 1, d_model)) -- initialized with small
    # deterministic values so the add is non-trivial to check.
    positional_encodings = 0.01 * jax.random.normal(
        kp, (max_len, 1, d_model), dtype=jnp.float32
    )

    out = learned_positional_embeddings(x, positional_encodings)
    out = jax.block_until_ready(out)

    ref = x + positional_encodings[:patches]
    assert out.shape == (patches, batch, d_model)
    assert jnp.allclose(out, ref, atol=1e-6), "mismatch vs reference (small shape)"

    # --- second check that actually exercises a multi-step grid ----------------
    p2, b2, d2 = 40, 8, 128
    ml2 = 128
    x2 = jax.random.normal(kx2, (p2, b2, d2), dtype=jnp.float32)
    pe2 = 0.01 * jax.random.normal(kp2, (ml2, 1, d2), dtype=jnp.float32)
    # Small tile budget -> tp=4, grid=(10,), pipelined over the patches axis.
    out2 = learned_positional_embeddings(x2, pe2, target_block_bytes=16 * 1024)
    out2 = jax.block_until_ready(out2)
    ref2 = x2 + pe2[:p2]
    assert jnp.allclose(out2, ref2, atol=1e-6), "mismatch vs reference (tiled shape)"

    print("KERNEL_OK")
</pallas_src>

<mosaic_0001>
module attributes {stable_mosaic.version = 11 : i64} {
  func.func @_add_pe_kernel(%arg0: i32, %arg1: memref<8x2x32xf32, #tpu.memory_space<vmem>>, %arg2: memref<8x1x32xf32, #tpu.memory_space<vmem>>, %arg3: memref<8x2x32xf32, #tpu.memory_space<vmem>>) attributes {dimension_semantics = [#tpu.dimension_semantics<parallel>], iteration_bounds = array<i64: 1>, scalar_prefetch = 0 : i64, scratch_operands = 0 : i64, tpu.core_type = #tpu.core_type<tc>, window_params = [{transform_indices = @transform_0, window_bounds = array<i64: 8, 2, 32>}, {transform_indices = @transform_1, window_bounds = array<i64: 8, 1, 32>}, {transform_indices = @transform_2, window_bounds = array<i64: 8, 2, 32>}]} {
    %c0 = arith.constant 0 : index
    %c0_0 = arith.constant 0 : index
    %c0_1 = arith.constant 0 : index
    %0 = vector.load %arg1[%c0, %c0_0, %c0_1] : memref<8x2x32xf32, #tpu.memory_space<vmem>>, vector<8x2x32xf32>
    %c0_2 = arith.constant 0 : index
    %c0_3 = arith.constant 0 : index
    %c0_4 = arith.constant 0 : index
    %1 = vector.load %arg2[%c0_2, %c0_3, %c0_4] : memref<8x1x32xf32, #tpu.memory_space<vmem>>, vector<8x1x32xf32>
    %2 = vector.broadcast %1 : vector<8x1x32xf32> to vector<8x2x32xf32>
    %3 = arith.addf %0, %2 : vector<8x2x32xf32>
    %c0_5 = arith.constant 0 : index
    %c0_6 = arith.constant 0 : index
    %c0_7 = arith.constant 0 : index
    %4 = vector.load %arg3[%c0_5, %c0_6, %c0_7] : memref<8x2x32xf32, #tpu.memory_space<vmem>>, vector<8x2x32xf32>
    tpu.vector_store %arg3[%c0_5, %c0_6, %c0_7], %3 {strides = array<i32>} : memref<8x2x32xf32, #tpu.memory_space<vmem>>, vector<8x2x32xf32>,
    return
  }
  func.func @transform_0(%arg0: i32) -> (i32, i32, i32) {
    %c0_i32 = arith.constant 0 : i32
    %c0_i32_0 = arith.constant 0 : i32
    %c0_i32_1 = arith.constant 0 : i32
    return %arg0, %c0_i32, %c0_i32_0 : i32, i32, i32
  }
  func.func @transform_1(%arg0: i32) -> (i32, i32, i32) {
    %c0_i32 = arith.constant 0 : i32
    %c0_i32_0 = arith.constant 0 : i32
    %c0_i32_1 = arith.constant 0 : i32
    return %arg0, %c0_i32, %c0_i32_0 : i32, i32, i32
  }
  func.func @transform_2(%arg0: i32) -> (i32, i32, i32) {
    %c0_i32 = arith.constant 0 : i32
    %c0_i32_0 = arith.constant 0 : i32
    %c0_i32_1 = arith.constant 0 : i32
    return %arg0, %c0_i32, %c0_i32_0 : i32, i32, i32
  }
}

</mosaic_0001>

<bundles_post_ra>
// kernel: tpu_custom_call.1
= control target key start
LH: loop header
LB: loop body
LE: loop exit
PB: predicated region body
PF: predicated region fallthrough
CT: control target
= control target key end

     0   :  { %vm84_vm0 = vcmask 254976   ;;  %s219_s0 = inlined_call_operand.vmem [shape: f32[8,2,32], index: 0, kind: input, shape index: {}]   ;;  %s220_s1 = inlined_call_operand.vmem [shape: f32[64,1,32], index: 1, kind: input, shape index: {}]   ;;  %s221_s2 = inlined_call_operand.hbm [shape: f32[8,2,32], index: 2, kind: output, shape index: {}]  }
   0x1   :  { %v12_v0 = vld [vmem:[%s219_s0] sm:$0x3]  ;;  %v13_v3 = vld [vmem:[%s219_s0 + $0x2] sm:$0x3]  ;;  %v14_v5 = vld [vmem:[%s219_s0 + $0x4] sm:$0x3] }
   0x2   :  { %v109_v1 = vld [vmem:[%s220_s1] ss:$0 sm:$0xff]  ;;  %v110_v4 = vld [vmem:[%s220_s1 + $0x1] ss:$0 sm:$0xff]  ;;  %v111_v7 = vld [vmem:[%s220_s1 + $0x2] ss:$0 sm:$0xff] }
   0x3   :  { %v76_v2 = vadd.f32 %v109_v1, %v12_v0  ;;  %v77_v6 = vadd.f32 %v110_v4, %v13_v3  ;;  %v15_v8 = vld [vmem:[%s219_s0 + $0x6] sm:$0x3]  ;;  %v112_v9 = vld [vmem:[%s220_s1 + $0x3] ss:$0 sm:$0xff]  ;;  %v78_v10 = vadd.f32 %v111_v7, %v14_v5  ;;  %v16_v12 = vld [vmem:[%s219_s0 + $0x8] sm:$0x3] }
   0x4   :  { %v79_v11 = vadd.f32 %v112_v9, %v15_v8  ;;  %v113_v13 = vld [vmem:[%s220_s1 + $0x4] ss:$0 sm:$0xff]  ;;  %v17_v14 = vld [vmem:[%s219_s0 + $0xa] sm:$0x3]  ;;  %v114_v16 = vld [vmem:[%s220_s1 + $0x5] ss:$0 sm:$0xff] }
   0x5   :  { %85 = vst.msk [vmem:[#allocation2] sm:$0x3] %vm84_vm0, %v76_v2  ;;  %86 = vst.msk [vmem:[#allocation2 + $0x2] sm:$0x3] %vm84_vm0, %v77_v6  ;;  %v80_v15 = vadd.f32 %v113_v13, %v16_v12  ;;  %v18_v17 = vld [vmem:[%s219_s0 + $0xc] sm:$0x3]  ;;  %v81_v19 = vadd.f32 %v114_v16, %v17_v14 }
   0x6   :  { %v115_v18 = vld [vmem:[%s220_s1 + $0x6] ss:$0 sm:$0xff]  ;;  %87 = vst.msk [vmem:[#allocation2 + $0x4] sm:$0x3] %vm84_vm0, %v78_v10  ;;  %88 = vst.msk [vmem:[#allocation2 + $0x6] sm:$0x3] %vm84_vm0, %v79_v11 }
   0x7   :  { %v82_v20 = vadd.f32 %v115_v18, %v18_v17  ;;  %v19_v21 = vld [vmem:[%s219_s0 + $0xe] sm:$0x3]  ;;  %v116_v22 = vld [vmem:[%s220_s1 + $0x7] ss:$0 sm:$0xff] }
   0x8   :  { %7 = vsyncpa [#allocation3], 0  ;;  %89 = vst.msk [vmem:[#allocation2 + $0x8] sm:$0x3] %vm84_vm0, %v80_v15  ;;  %v83_v23 = vadd.f32 %v116_v22, %v19_v21  ;;  %s142_s13 = smov [#allocation2]  }
   0x9   :  { %s98_s14 = sshll.u32 %s142_s13, 4  ;;  %90 = vst.msk [vmem:[#allocation2 + $0xa] sm:$0x3] %vm84_vm0, %v81_v19  ;;  %91 = vst.msk [vmem:[#allocation2 + $0xc] sm:$0x3] %vm84_vm0, %v82_v20  ;;  %s99_s14 = int_to_ptr.vmem [resolvable:$true] %s98_s14 }
   0xa   :  { %92 = vst.msk [vmem:[#allocation2 + $0xe] sm:$0x3] %vm84_vm0, %v83_v23  ;;  %s120_s15 = scalar_lea.vmem %s99_s14, 256  ;;  %p125_p1 = scmp.lt.s32.totalorder %s99_s14, %s99_s14 }
   0xb   :  { %p121_p0 = scmp.ne.s32.totalorder %s99_s14, %s120_s15  ;;  %p126_p2 = scmp.lt.s32.totalorder %s120_s15, %s120_s15 }
   0xd   :  { %p127_p3 = por %p126_p2, %p125_p1 }
   0xf   :  { %p128_p4 = pnand %p127_p3, %p121_p0 }
  0x11   :  { %131 = shalt.err (!%p128_p4)
}
  0x12   :  { %s143_s0 = smov 32   ;;  %s144_s1 = smov 2  }
  0x13   :  { %104 = dma.vmem_to_hbm [thread:$0]  %s99_s14, 256, %s221_s2, [#allocation3], %s143_s0, %s143_s0, %s144_s1  }
  0x14   :  { %140 = dma.done.wait [#allocation3], 256  }
  0x15   :  { %141 = vsyncadd [#allocation3], 4294967040 }
  0x16   :  { %108 = vsyncpa [#allocation3], 1 }

</bundles_post_ra>
